<compile_context>
chip_gen: v6e
topology: v6e:2x2x1
jax: 0.10.0
libtpu: 0.0.40
codegen_flags: <defaults>
</compile_context>

<pallas_src>
import functools

import jax
import jax.numpy as jnp
import jax.scipy.special as jsp
import numpy as np
from jax import lax
from jax.experimental import pallas as pl
from jax.experimental.pallas import tpu as pltpu

C, H, W = 3, 21, 21
P = C * H * W  # 1323

# ~4 MiB of f32 rows per rate block (keeps the block-sized f32 temporaries of
# the elementwise log comfortably inside a 48 MiB scoped-VMEM budget on all of
# v5e / v6e / v7x).
_TARGET_ROWS = (4 * 1024 * 1024) // (P * 4)  # ~792 rows of P


def _cdiv(a, b):
    return -(-a // b)


def _round_up(x, m):
    return _cdiv(x, m) * m


def _poisson_ll_kernel(rate_ref, cml_ref, ll_ref, slog_ref, srate_ref,
                       *, m_total, need_mask):
    """Masked Poisson log-likelihood, reduced over MC samples and pixels.

    rate_ref: (bb, tm, P)   Poisson rates, one M-chunk per grid step
    cml_ref:  (bb, 3, P)    packed [counts, masks, lgamma(counts+1)]
    ll_ref:   (bb, 1, 128)  per-example masked-mean log-likelihood (lane bcast)
    slog_ref / srate_ref: (bb, P) f32 accumulators: sum_M log(rate), sum_M rate
    """
    m = pl.program_id(1)
    tm = rate_ref.shape[1]

    @pl.when(m == 0)
    def _():
        slog_ref[...] = jnp.zeros_like(slog_ref)
        srate_ref[...] = jnp.zeros_like(srate_ref)

    # O(M*P) work: only log + two sums over the M axis live here.
    r = rate_ref[...].astype(jnp.float32)                    # (bb, tm, P)
    if need_mask:
        # Edge M block: mask rows >= m_total BEFORE the log so stale VMEM
        # contents cannot inject NaN/-inf into the accumulators.
        row = lax.broadcasted_iota(jnp.int32, r.shape, 1)
        valid = (m * tm + row) < m_total
        slog_ref[...] += jnp.sum(jnp.log(jnp.where(valid, r, 1.0)), axis=1)
        srate_ref[...] += jnp.sum(jnp.where(valid, r, 0.0), axis=1)
    else:
        slog_ref[...] += jnp.sum(jnp.log(r), axis=1)          # (bb, P)
        srate_ref[...] += jnp.sum(r, axis=1)                  # (bb, P)

    @pl.when(m == pl.num_programs(1) - 1)
    def _():
        cml = cml_ref[...]                                    # (bb, 3, P)
        counts = cml[:, 0, :]
        masks = cml[:, 1, :]
        logfact = cml[:, 2, :]

        # sum_M Poisson(rate).log_prob(counts) =
        #   counts * sum_M log(rate) - sum_M rate - M * lgamma(counts + 1)
        term = (counts * slog_ref[...] - srate_ref[...]
                - jnp.float32(m_total) * logfact)
        # where(mask>0, ...) only sanitizes 0 * (-inf) for masked-out rate==0.
        masked = jnp.where(masks > 0, masks * term, 0.0)      # (bb, P)
        ll_sum = jnp.sum(masked, axis=1, keepdims=True)       # (bb, 1)
        mask_sum = jnp.sum(masks, axis=1, keepdims=True)      # (bb, 1)
        # Matches torch exactly: mean over M, sum over P, divide by masks.sum.
        ll = ll_sum / (jnp.float32(m_total) * mask_sum)
        ll_ref[...] = jnp.broadcast_to(ll[:, :, None], ll_ref.shape)


def _choose_tiles(B, M, dtype):
    itemsize = np.dtype(dtype).itemsize
    sub = 8 * max(1, 4 // itemsize)            # 8 rows (f32), 16 rows (bf16)
    cap = max(sub, (_TARGET_ROWS // sub) * sub)
    if M <= cap:
        tm = M                                 # full-M block: no remainder rows
    else:
        n_m = _cdiv(M, cap)                    # tm (nearly) divides M
        tm = _round_up(_cdiv(M, n_m), sub)
    bb = max(1, min(B, cap // max(tm, 1)))
    if B >= 2:
        # Keep >= 2 blocks on the "parallel" batch axis so the second v7x
        # TensorCore has work.
        bb = min(bb, max(1, B // 2))
    return bb, tm


def _poisson_ll_pallas(rate, counts, masks, tile_override=None):
    B, M, P_ = rate.shape
    assert P_ == P
    if not jnp.issubdtype(rate.dtype, jnp.floating):
        rate = rate.astype(jnp.float32)

    if tile_override is None:
        bb, tm = _choose_tiles(B, M, rate.dtype)
    else:
        bb, tm = tile_override
    n_b = _cdiv(B, bb)
    n_m = _cdiv(M, tm)
    need_mask = (n_m * tm != M)

    counts = counts.astype(jnp.float32)
    masks = masks.astype(jnp.float32)
    logfact = lax.lgamma(counts + 1.0)         # no lgamma lowering in Mosaic
    cml = jnp.stack([counts, masks, logfact], axis=1)        # (B, 3, P)

    kernel = functools.partial(_poisson_ll_kernel,
                               m_total=M, need_mask=need_mask)
    ll_out = pl.pallas_call(
        kernel,
        out_shape=jax.ShapeDtypeStruct((B, 1, 128), jnp.float32),
        grid=(n_b, n_m),
        in_specs=[
            pl.BlockSpec((bb, tm, P), lambda b, m: (b, m, 0)),
            pl.BlockSpec((bb, 3, P), lambda b, m: (b, 0, 0)),
        ],
        out_specs=pl.BlockSpec((bb, 1, 128), lambda b, m: (b, 0, 0)),
        scratch_shapes=[pltpu.VMEM((bb, P), jnp.float32),
                        pltpu.VMEM((bb, P), jnp.float32)],
        compiler_params=pltpu.CompilerParams(
            dimension_semantics=("parallel", "arbitrary"),
            vmem_limit_bytes=48 * 1024 * 1024),
    )(rate, cml)
    return ll_out[:, 0, 0]                                    # (B,)


def unet_loss_forward(rate, counts, q_p_mean, q_bg_concentration, q_bg_rate,
                      masks, p_bg_concentration=1.0, p_bg_rate=1.0,
                      p_bg_scale=1e-4, p_p_scale=1e-4):
    """JAX/Pallas equivalent of UnetLoss.forward for the default config
    (p_p_name=None -> kl_p == 0, p_bg = Gamma(1,1), q_bg = Gamma(a_q, b_q))."""
    del q_p_mean  # only needed for the q_p||p_p KL, which is 0 by default
    B = rate.shape[0]
    counts = counts.reshape(B, P)
    masks = masks.reshape(B, P)

    ll_mean = _poisson_ll_pallas(rate, counts, masks)          # (B,)
    neg_ll_batch = jnp.sum(-ll_mean)                           # scalar (.sum())

    # KL( Gamma(a_q, b_q) || Gamma(a_p, b_p) ) -- closed form, matches
    # torch.distributions.kl._kl_gamma_gamma.
    aq = q_bg_concentration.reshape(-1).astype(jnp.float32)
    bq = q_bg_rate.reshape(-1).astype(jnp.float32)
    ap = jnp.float32(p_bg_concentration)
    bp = jnp.float32(p_bg_rate)
    kl_bg = (ap * jnp.log(bq / bp)
             + jsp.gammaln(ap) - jsp.gammaln(aq)
             + (aq - ap) * jsp.digamma(aq)
             + (bp - bq) * (aq / bq))                          # (B,)

    kl_p = jnp.float32(0.0)
    # TODO(synk): the q_p || p_p KL (Dirichlet / other priors when p_p_name is
    # not None) and the MC-sampling KL fallback are not ported.
    kl_terms = kl_bg * jnp.float32(p_bg_scale) + kl_p * jnp.float32(p_p_scale)

    # Matches torch exactly: scalar neg_ll_batch broadcast-added to per-batch
    # kl_terms, then mean -> sum(-ll) + mean(kl_terms).
    batch_loss = neg_ll_batch + kl_terms                       # (B,)
    total_loss = jnp.mean(batch_loss)

    return (total_loss,
            neg_ll_batch,            # neg_ll_batch.mean() of a scalar
            jnp.mean(kl_terms),
            jnp.mean(kl_bg),
            kl_p)


if __name__ == "__main__":
    key = jax.random.PRNGKey(0)
    B, M = 3, 12
    k1, k2, k3, k4, k5, k6 = jax.random.split(key, 6)

    # rate > 0 (Poisson rate), counts are non-negative integers (as floats)
    rate = jax.random.uniform(k1, (B, M, P), jnp.float32, 0.5, 5.0)
    counts = jnp.floor(jax.random.uniform(k2, (B, P), jnp.float32, 0.0, 10.0))
    masks = (jax.random.uniform(k3, (B, P), jnp.float32) > 0.2).astype(jnp.float32)
    q_p_mean = jax.nn.softmax(jax.random.normal(k4, (B, P), jnp.float32), axis=-1)
    q_bg_concentration = jax.random.uniform(k5, (B, 1), jnp.float32, 0.5, 2.0)
    q_bg_rate = jax.random.uniform(k6, (B, 1), jnp.float32, 0.5, 2.0)

    out = jax.jit(unet_loss_forward)(rate, counts, q_p_mean,
                                     q_bg_concentration, q_bg_rate, masks)
    out = jax.block_until_ready(out)

    # Pure-JAX reference (same math as the torch module) for a sanity check.
    def _ref(rate, counts, masks, aq, bq):
        lp = (counts[:, None, :] * jnp.log(rate) - rate
              - lax.lgamma(counts[:, None, :] + 1.0))
        ll = (lp * masks[:, None, :]).mean(1).sum(1) / masks.sum(1)
        neg_ll = jnp.sum(-ll)
        kl_bg = (jnp.log(bq) - jsp.gammaln(aq)
                 + (aq - 1.0) * jsp.digamma(aq) + (1.0 - bq) * (aq / bq))
        kl_terms = kl_bg * 1e-4
        return (jnp.mean(neg_ll + kl_terms), neg_ll, jnp.mean(kl_terms),
                jnp.mean(kl_bg), jnp.float32(0.0)), ll

    ref_out, ll_ref = _ref(rate, counts, masks,
                           q_bg_concentration.reshape(-1),
                           q_bg_rate.reshape(-1))
    for got, want in zip(out, ref_out):
        np.testing.assert_allclose(np.asarray(got), np.asarray(want),
                                   rtol=2e-3, atol=2e-3)

    # Exercise the in-kernel masked remainder paths explicitly:
    #  - (1, 8): M=12 does not divide tm=8 -> masked edge M block
    #  - (2, M): bb=2 does not divide B=3 -> partial edge batch block
    for override in ((1, 8), (2, M)):
        ll_kernel = jax.block_until_ready(
            _poisson_ll_pallas(rate, counts, masks, tile_override=override))
        np.testing.assert_allclose(np.asarray(ll_kernel), np.asarray(ll_ref),
                                   rtol=2e-3, atol=2e-3)

    print("KERNEL_OK")
</pallas_src>

<mosaic_0001>
module attributes {stable_mosaic.version = 11 : i64} {
  func.func @_poisson_ll_kernel(%arg0: i32, %arg1: i32, %arg2: memref<1x12x1323xf32, #tpu.memory_space<vmem>>, %arg3: memref<1x3x1323xf32, #tpu.memory_space<vmem>>, %arg4: memref<1x1x128xf32, #tpu.memory_space<vmem>>, %arg5: memref<1x1323xf32, #tpu.memory_space<vmem>>, %arg6: memref<1x1323xf32, #tpu.memory_space<vmem>>) attributes {dimension_semantics = [#tpu.dimension_semantics<parallel>, #tpu.dimension_semantics<arbitrary>], iteration_bounds = array<i64: 3, 1>, scalar_prefetch = 0 : i64, scratch_operands = 2 : i64, tpu.core_type = #tpu.core_type<tc>, window_params = [{transform_indices = @transform_0, window_bounds = array<i64: 1, 12, 1323>}, {transform_indices = @transform_1, window_bounds = array<i64: 1, 3, 1323>}, {transform_indices = @transform_2, window_bounds = array<i64: 1, 1, 128>}]} {
    %c0_i32 = arith.constant 0 : i32
    %0 = arith.cmpi eq, %arg1, %c0_i32 : i32
    %1 = arith.extui %0 : i1 to i32
    %c0_i32_0 = arith.constant 0 : i32
    %2 = arith.cmpi ne, %1, %c0_i32_0 : i32
    scf.if %2 {
      %cst_14 = arith.constant 0.000000e+00 : f32
      %16 = vector.broadcast %cst_14 : f32 to vector<1x1323xf32>
      %c0_15 = arith.constant 0 : index
      %c0_16 = arith.constant 0 : index
      %17 = vector.load %arg5[%c0_15, %c0_16] : memref<1x1323xf32, #tpu.memory_space<vmem>>, vector<1x1323xf32>
      tpu.vector_store %arg5[%c0_15, %c0_16], %16 {strides = array<i32>} : memref<1x1323xf32, #tpu.memory_space<vmem>>, vector<1x1323xf32>,
      %cst_17 = arith.constant 0.000000e+00 : f32
      %18 = vector.broadcast %cst_17 : f32 to vector<1x1323xf32>
      %c0_18 = arith.constant 0 : index
      %c0_19 = arith.constant 0 : index
      %19 = vector.load %arg6[%c0_18, %c0_19] : memref<1x1323xf32, #tpu.memory_space<vmem>>, vector<1x1323xf32>
      tpu.vector_store %arg6[%c0_18, %c0_19], %18 {strides = array<i32>} : memref<1x1323xf32, #tpu.memory_space<vmem>>, vector<1x1323xf32>,
    } else {
    }
    %c0 = arith.constant 0 : index
    %c0_1 = arith.constant 0 : index
    %c0_2 = arith.constant 0 : index
    %3 = vector.load %arg2[%c0, %c0_1, %c0_2] : memref<1x12x1323xf32, #tpu.memory_space<vmem>>, vector<1x12x1323xf32>
    %c0_3 = arith.constant 0 : index
    %c0_4 = arith.constant 0 : index
    %4 = vector.load %arg5[%c0_3, %c0_4] : memref<1x1323xf32, #tpu.memory_space<vmem>>, vector<1x1323xf32>
    %5 = math.log %3 : vector<1x12x1323xf32>
    %cst = arith.constant dense<0.000000e+00> : vector<1x1323xf32>
    %6 = vector.multi_reduction <add>, %5, %cst [1] : vector<1x12x1323xf32> to vector<1x1323xf32>
    %7 = arith.addf %4, %6 : vector<1x1323xf32>
    %c0_5 = arith.constant 0 : index
    %c0_6 = arith.constant 0 : index
    %8 = vector.load %arg5[%c0_5, %c0_6] : memref<1x1323xf32, #tpu.memory_space<vmem>>, vector<1x1323xf32>
    tpu.vector_store %arg5[%c0_5, %c0_6], %7 {strides = array<i32>} : memref<1x1323xf32, #tpu.memory_space<vmem>>, vector<1x1323xf32>,
    %c0_7 = arith.constant 0 : index
    %c0_8 = arith.constant 0 : index
    %9 = vector.load %arg6[%c0_7, %c0_8] : memref<1x1323xf32, #tpu.memory_space<vmem>>, vector<1x1323xf32>
    %cst_9 = arith.constant dense<0.000000e+00> : vector<1x1323xf32>
    %10 = vector.multi_reduction <add>, %3, %cst_9 [1] : vector<1x12x1323xf32> to vector<1x1323xf32>
    %11 = arith.addf %9, %10 : vector<1x1323xf32>
    %c0_10 = arith.constant 0 : index
    %c0_11 = arith.constant 0 : index
    %12 = vector.load %arg6[%c0_10, %c0_11] : memref<1x1323xf32, #tpu.memory_space<vmem>>, vector<1x1323xf32>
    tpu.vector_store %arg6[%c0_10, %c0_11], %11 {strides = array<i32>} : memref<1x1323xf32, #tpu.memory_space<vmem>>, vector<1x1323xf32>,
    %c0_i32_12 = arith.constant 0 : i32
    %13 = arith.cmpi eq, %arg1, %c0_i32_12 : i32
    %14 = arith.extui %13 : i1 to i32
    %c0_i32_13 = arith.constant 0 : i32
    %15 = arith.cmpi ne, %14, %c0_i32_13 : i32
    scf.if %15 {
      %c0_14 = arith.constant 0 : index
      %c0_15 = arith.constant 0 : index
      %c0_16 = arith.constant 0 : index
      %16 = vector.load %arg3[%c0_14, %c0_15, %c0_16] : memref<1x3x1323xf32, #tpu.memory_space<vmem>>, vector<1x3x1323xf32>
      %17 = vector.extract_strided_slice %16 {offsets = [0, 0, 0], sizes = [1, 1, 1323], strides = [1, 1, 1]} : vector<1x3x1323xf32> to vector<1x1x1323xf32>
      %18 = vector.shape_cast %17 : vector<1x1x1323xf32> to vector<1x1323xf32>
      %19 = vector.extract_strided_slice %16 {offsets = [0, 1, 0], sizes = [1, 1, 1323], strides = [1, 1, 1]} : vector<1x3x1323xf32> to vector<1x1x1323xf32>
      %20 = vector.shape_cast %19 : vector<1x1x1323xf32> to vector<1x1323xf32>
      %21 = vector.extract_strided_slice %16 {offsets = [0, 2, 0], sizes = [1, 1, 1323], strides = [1, 1, 1]} : vector<1x3x1323xf32> to vector<1x1x1323xf32>
      %22 = vector.shape_cast %21 : vector<1x1x1323xf32> to vector<1x1323xf32>
      %c0_17 = arith.constant 0 : index
      %c0_18 = arith.constant 0 : index
      %23 = vector.load %arg5[%c0_17, %c0_18] : memref<1x1323xf32, #tpu.memory_space<vmem>>, vector<1x1323xf32>
      %24 = arith.mulf %18, %23 : vector<1x1323xf32>
      %c0_19 = arith.constant 0 : index
      %c0_20 = arith.constant 0 : index
      %25 = vector.load %arg6[%c0_19, %c0_20] : memref<1x1323xf32, #tpu.memory_space<vmem>>, vector<1x1323xf32>
      %26 = arith.subf %24, %25 : vector<1x1323xf32>
      %cst_21 = arith.constant 1.200000e+01 : f32
      %27 = vector.broadcast %cst_21 : f32 to vector<1x1323xf32>
      %28 = arith.mulf %27, %22 : vector<1x1323xf32>
      %29 = arith.subf %26, %28 : vector<1x1323xf32>
      %cst_22 = arith.constant 0.000000e+00 : f32
      %30 = vector.broadcast %cst_22 : f32 to vector<1x1323xf32>
      %31 = arith.cmpf ogt, %20, %30 : vector<1x1323xf32>
      %32 = arith.mulf %20, %29 : vector<1x1323xf32>
      %cst_23 = arith.constant 0.000000e+00 : f32
      %33 = vector.broadcast %cst_23 : f32 to vector<1x1323xf32>
      %34 = arith.select %31, %32, %33 : vector<1x1323xi1>, vector<1x1323xf32>
      %cst_24 = arith.constant dense<0.000000e+00> : vector<1xf32>
      %35 = vector.multi_reduction <add>, %34, %cst_24 [1] : vector<1x1323xf32> to vector<1xf32>
      %36 = vector.shape_cast %35 : vector<1xf32> to vector<1x1xf32>
      %cst_25 = arith.constant dense<0.000000e+00> : vector<1xf32>
      %37 = vector.multi_reduction <add>, %20, %cst_25 [1] : vector<1x1323xf32> to vector<1xf32>
      %38 = vector.shape_cast %37 : vector<1xf32> to vector<1x1xf32>
      %cst_26 = arith.constant 1.200000e+01 : f32
      %39 = vector.broadcast %cst_26 : f32 to vector<1x1xf32>
      %40 = arith.mulf %39, %38 : vector<1x1xf32>
      %41 = arith.divf %36, %40 : vector<1x1xf32>
      %42 = vector.shape_cast %41 : vector<1x1xf32> to vector<1x1x1xf32>
      %43 = vector.shape_cast %42 : vector<1x1x1xf32> to vector<1x1x1xf32>
      %44 = vector.broadcast %43 : vector<1x1x1xf32> to vector<1x1x128xf32>
      %c0_27 = arith.constant 0 : index
      %c0_28 = arith.constant 0 : index
      %c0_29 = arith.constant 0 : index
      %45 = vector.load %arg4[%c0_27, %c0_28, %c0_29] : memref<1x1x128xf32, #tpu.memory_space<vmem>>, vector<1x1x128xf32>
      tpu.vector_store %arg4[%c0_27, %c0_28, %c0_29], %44 {strides = array<i32>} : memref<1x1x128xf32, #tpu.memory_space<vmem>>, vector<1x1x128xf32>,
    } else {
    }
    return
  }
  func.func @transform_0(%arg0: i32, %arg1: i32) -> (i32, i32, i32) {
    %c0_i32 = arith.constant 0 : i32
    %c0_i32_0 = arith.constant 0 : i32
    return %arg0, %arg1, %c0_i32 : i32, i32, i32
  }
  func.func @transform_1(%arg0: i32, %arg1: i32) -> (i32, i32, i32) {
    %c0_i32 = arith.constant 0 : i32
    %c0_i32_0 = arith.constant 0 : i32
    %c0_i32_1 = arith.constant 0 : i32
    return %arg0, %c0_i32, %c0_i32_0 : i32, i32, i32
  }
  func.func @transform_2(%arg0: i32, %arg1: i32) -> (i32, i32, i32) {
    %c0_i32 = arith.constant 0 : i32
    %c0_i32_0 = arith.constant 0 : i32
    %c0_i32_1 = arith.constant 0 : i32
    return %arg0, %c0_i32, %c0_i32_0 : i32, i32, i32
  }
}

</mosaic_0001>

<bundles_post_ra>
// kernel: unet_loss_forward.1
= control target key start
LH: loop header
LB: loop body
LE: loop exit
PB: predicated region body
PF: predicated region fallthrough
CT: control target
= control target key end

     0   :  { %s1221_s9 = smov 0   ;;  %s1223_s10 = smov 0   ;;  %s1567_s0 = inlined_call_operand.vmem [shape: f32[3,12,1323], index: 0, kind: input, shape index: {}]   ;;  %s1568_s1 = inlined_call_operand.vmem [shape: f32[3,3,1323], index: 1, kind: input, shape index: {}]   ;;  %s1569_s2 = inlined_call_operand.vmem [shape: f32[3,1,128], index: 2, kind: output, shape index: {}]  }
   0x1   :  { %s1225_s11 = smov 0  }
   0x2 LB: > { %s24_s12 = sadd.s32 1, %s1194_s10  ;;  %p1087_p0 = scmp.ge.s32.totalorder %s1198_s11, 1  ;;  %s1198_s11 = sphi %s1225_s11, %s12_s11   ;;  %s1194_s10 = sphi %s1223_s10, %s1587_s10   ;;  %s1190_s9 = sphi %s1221_s9, %s1586_s9  }
   0x3   : > { %p26_p1 = scmp.ge.s32.totalorder %s24_s12, 3  ;;  %p142_p2 = scmp.lt.s32.totalorder %s1198_s11, 4 }
   0x5   : > { %s1589_s12 = smov (%p26_p1, %s24_s12), 0  ;;  %p143_p3 = pnand %p1087_p0, %p142_p2 }
   0x7   : > { %146 = sbr.rel (%p143_p3) target bundleno = 275 (0x113), region = 28 }
   0xc   : > { %p173_p4 = scmp.lt.s32.totalorder %s1190_s9, 2  ;;  %v196_v0 = vlaneseq  ;;  %v1200_v3 = vmov 1966171168   ;;  %v1201_v5 = vmov 0.0   ;;  %v1202_v8 = vmov 286326784  }
   0xd   : > { %v379_v4 = vunpack.c.l.s4 %v1200_v3  ;;  %v650_v9 = vunpack.c.l.s4 %v1202_v8  ;;  %vm894_vm1 = vcmask 1041409   ;;  %vm914_vm2 = vcmask 345089  }
   0xe   : > { %s1591_s9 = smov (!%p173_p4, %s1190_s9), 2  ;;  %v1241_v1 = vshrl.u32 %v196_v0, 7  ;;  %vm1243_vm0 = vcmp.lt.s32.totalorder %v196_v0, 299  ;;  %v1203_v11 = vmov 858989090   ;;  %vm271_vm3 = vcmask 1043456  }
   0xf   : > { %200 = vst.msk [vmem:[#allocation2 + $0x8] sm:$0x7] %vm1243_vm0, %v1201_v5  ;;  %202 = vst.msk [vmem:[#allocation3 + $0x8] sm:$0x7] %vm1243_vm0, %v1201_v5  ;;  %s1099_s13 = smul.u32 44, %s1591_s9  ;;  %v380_v10 = vunpack.c.0.s8 %v379_v4  ;;  %v657_v12 = vunpack.c.l.s4 %v1203_v11  ;;  %v651_v20 = vunpack.c.0.s8 %v650_v9  ;;  %vm352_vm4 = vcmask 351232   ;;  %s190_s23 = scalar_lea.vmem %s1569_s2, %s1591_s9 }
  0x10   : > { %v1253_v6 = vsub.s32 1, %v1241_v1  ;;  %v1256_v7 = vsub.s32 5, %v1241_v1  ;;  %s1098_s14 = smul.u32 176, %s1591_s9  ;;  %v1204_v24 = vmov 1431651396   ;;  %vm354_vm5 = vcmask 347136  }
  0x11   : > { %s187_s17 = scalar_lea.vmem %s1568_s1, %s1099_s13  ;;  %v1286_v23 = vsub.s32 %v380_v10, %v1241_v1  ;;  %v664_v25 = vunpack.c.l.s4 %v1204_v24  ;;  %v1205_v26 = vmov 2004313702   ;;  %v658_v33 = vunpack.c.0.s8 %v657_v12 }
  0x12   : > { %1578 = vst [vmem:[#allocation4_spill] sm:$0xff] %v1253_v6  ;;  %1579 = vst [vmem:[#allocation5_spill] sm:$0xff] %v1256_v7  ;;  %v1262_v13 = vld [vmem:[%s187_s17] sm:$0x77]  ;;  %v1264_v14 = vld [vmem:[%s187_s17 + $0x8] sm:$0x77]  ;;  %s1271_s20 = scalar_lea.vmem %s1567_s0, %s1098_s14  ;;  %v1288_v27 = vunpack.c.l.s4 %v1205_v26  ;;  %v1311_v43 = vsub.s32 %v651_v20, %v1241_v1 }
  0x13   : > { %v1266_v15 = vld [vmem:[%s187_s17 + $0x10] sm:$0x77]  ;;  %v1273_v16 = vld [vmem:[%s187_s17 + $0x18] sm:$0x77]  ;;  %v928_v17 = vrot.slane %v1262_v13, %v1253_v6  ;;  %v932_v18 = vrot.slane %v1262_v13, %v1256_v7  ;;  %v936_v19 = vrot.slane %v1264_v14, %v1253_v6  ;;  %v1281_v21 = vld [vmem:[%s187_s17 + $0x20] sm:$0x77]  ;;  %v940_v22 = vrot.slane %v1264_v14, %v1256_v7 }
  0x14   : > { %v1290_v28 = vld [vmem:[%s187_s17 + $0x28] sm:$0x7]  ;;  %v944_v29 = vrot.slane %v1266_v15, %v1253_v6  ;;  %v948_v30 = vrot.slane %v1266_v15, %v1256_v7  ;;  %v203_v32 = vld [vmem:[%s1271_s20] sm:$0xff]  ;;  %v952_v34 = vrot.slane %v1273_v16, %v1253_v6  ;;  %v956_v35 = vrot.slane %v1273_v16, %v1256_v7  ;;  %v205_v42 = vld [vmem:[%s1271_s20 + $0x10] sm:$0xff] }
  0x15   : > { %1580 = vst [vmem:[#allocation6_spill] sm:$0xff] %v1290_v28  ;;  %v980_v31 = vsel %vm894_vm1, %v928_v17, 0.0  ;;  %v981_v36 = vsel %vm894_vm1, %v932_v18, 0.0  ;;  %v983_v37 = vsel %vm894_vm1, %v936_v19, 0.0  ;;  %v204_v38 = vld [vmem:[%s1271_s20 + $0x8] sm:$0xff]  ;;  %v960_v39 = vrot.slane %v1281_v21, %v1253_v6  ;;  %v206_v46 = vld [vmem:[%s1271_s20 + $0x18] sm:$0xff] }
  0x16   : > { %v964_v40 = vrot.slane %v1281_v21, %v1256_v7  ;;  %v982_v41 = vadd.f32 %v981_v36, %v980_v31  ;;  %v968_v44 = vrot.slane %v1290_v28, %v1253_v6  ;;  %v985_v45 = vsel %vm894_vm1, %v940_v22, 0.0  ;;  %v207_v50 = vld [vmem:[%s1271_s20 + $0x20] sm:$0xff]  ;;  %v1324_v55 = vld [vmem:[%s1271_s20 + $0x28] sm:$0xff]  ;;  %v1329_v59 = vld [vmem:[%s1271_s20 + $0x30] sm:$0xff] }
  0x17   : > { %1130 = vlog2.f32 %v203_v32  ;;  %v665_v47 = vunpack.c.0.s8 %v664_v25  ;;  %v987_v49 = vsel %vm894_vm1, %v944_v29, 0.0  ;;  %v989_v52 = vsel %vm894_vm1, %v948_v30, 0.0  ;;  %v1335_v61 = vld [vmem:[%s1271_s20 + $0x38] sm:$0xff]  ;;  %v215_v63 = vld [vmem:[%s1271_s20 + $0x60] sm:$0xf]  ;;  %v1353_v11 = vld [vmem:[%s1271_s20 + $0x48] sm:$0xff] }
  0x18   : > { %v984_v48 = vadd.f32 %v983_v37, %v982_v41  ;;  %1132 = vlog2.f32 %v204_v38  ;;  %v991_v53 = vsel %vm894_vm1, %v952_v34, 0.0  ;;  %v993_v54 = vsel %vm894_vm1, %v956_v35, 0.0  ;;  %v214_v62 = vld [vmem:[%s1271_s20 + $0x58] sm:$0xf]  ;;  %v1346_v5 = vld [vmem:[%s1271_s20 + $0x40] sm:$0xff]  ;;  %v1359_v22 = vld [vmem:[%s1271_s20 + $0x50] sm:$0xff] }
  0x19   : > { %1134 = vlog2.f32 %v205_v42  ;;  %v995_v57 = vsel %vm894_vm1, %v960_v39, 0.0  ;;  %v997_v58 = vsel %vm894_vm1, %v964_v40, 0.0  ;;  %v1332_v60 = vsel %vm914_vm2, %v968_v44, 0.0  ;;  %v216_v8 = vld [vmem:[%s1271_s20 + $0x68] sm:$0xf] }
  0x1a   : > { %v986_v56 = vadd.f32 %v985_v45, %v984_v48  ;;  %1136 = vlog2.f32 %v206_v46  ;;  %v1340_v0 = vsub.s32 %v658_v33, %v1241_v1  ;;  %v1343_v3 = vsub.s32 %v665_v47, %v1241_v1  ;;  %v217_v12 = vld [vmem:[%s1271_s20 + $0x70] sm:$0xf]  ;;  %v218_v26 = vld [vmem:[%s1271_s20 + $0x78] sm:$0xf]  ;;  %v219_v47 = vld [vmem:[%s1271_s20 + $0x80] sm:$0xf] }
  0x1b   : > { %1138 = vlog2.f32 %v207_v50  ;;  %v458_v9 = vsel %vm271_vm3, %v214_v62, 0.0  ;;  %v466_v10 = vsel %vm271_vm3, %v215_v63, 0.0  ;;  %v474_v19 = vsel %vm271_vm3, %v216_v8, 0.0 }
  0x1c   : > { %v988_v4 = vadd.f32 %v987_v49, %v986_v56  ;;  %1140 = vlog2.f32 %v1324_v55  ;;  %v459_v17 = vadd.f32 %v458_v9, %v203_v32  ;;  %v467_v18 = vadd.f32 %v466_v10, %v204_v38  ;;  %v222_v10 = vld [vmem:[%s1271_s20 + $0x98] sm:$0xf] }
  0x1d   : > { %1142 = vlog2.f32 %v1329_v59  ;;  %v475_v24 = vadd.f32 %v474_v19, %v205_v42  ;;  %v482_v25 = vsel %vm271_vm3, %v217_v12, 0.0  ;;  %v490_v34 = vsel %vm271_vm3, %v218_v26, 0.0 }
  0x1e   : > { %v990_v20 = vadd.f32 %v989_v52, %v988_v4  ;;  %1144 = vlog2.f32 %v1335_v61  ;;  %v460_v29 = vrot.slane %v459_v17, 4  ;;  %v468_v30 = vrot.slane %v467_v18, 4  ;;  %v221_v4 = vld [vmem:[%s1271_s20 + $0x90] sm:$0xf] }
  0x1f   : > { %1146 = vlog2.f32 %v1346_v5  ;;  %v483_v31 = vadd.f32 %v482_v25, %v206_v46  ;;  %v476_v32 = vrot.slane %v475_v24, 4  ;;  %v491_v40 = vadd.f32 %v490_v34, %v207_v50 }
  0x20   : > { %v992_v33 = vadd.f32 %v991_v53, %v990_v20  ;;  %1148 = vlog2.f32 %v1353_v11  ;;  %v461_v35 = vadd.f32 %v460_v29, %v459_v17  ;;  %v469_v36 = vadd.f32 %v468_v30, %v467_v18  ;;  %v220_v53 = vld [vmem:[%s1271_s20 + $0x88] sm:$0xf] }
  0x21   : > { %1150 = vlog2.f32 %v1359_v22  ;;  %v484_v37 = vrot.slane %v483_v31, 4  ;;  %v477_v39 = vadd.f32 %v476_v32, %v475_v24  ;;  %v492_v49 = vrot.slane %v491_v40, 4  ;;  %v1380_v24 = vld [vmem:[%s1271_s20 + $0xa0] sm:$0xf]  ;;  %v1385_v29 = vld [vmem:[%s1271_s20 + $0xa8] sm:$0xf] }
  0x22   : > { %v994_v38 = vadd.f32 %v993_v54, %v992_v33  ;;  %1152 = vlog2.f32 %v214_v62  ;;  %v462_v41 = vrot.slane %v461_v35, 2  ;;  %v470_v42 = vrot.slane %v469_v36, 2 }
  0x23   : > { %1154 = vlog2.f32 %v215_v63  ;;  %v485_v44 = vadd.f32 %v484_v37, %v483_v31  ;;  %v478_v48 = vrot.slane %v477_v39, 2  ;;  %vm797_vm6 = vcmp.gt.f32.partialorder %v1262_v13, 0.0 }
  0x24   : > { %v1131_v45 = vpop.eup %1130  ;;  %v996_v46 = vadd.f32 %v995_v57, %v994_v38  ;;  %1156 = vlog2.f32 %v216_v8  ;;  %v463_v54 = vadd.f32 %v462_v41, %v461_v35  ;;  %v471_v62 = vadd.f32 %v470_v42, %v469_v36 }
  0x25   : > { %v1133_v52 = vpop.eup %1132  ;;  %v1370_v56 = vmul.f32 0.6931472, %v1131_v45  ;;  %1158 = vlog2.f32 %v217_v12  ;;  %v479_v57 = vadd.f32 %v478_v48, %v477_v39  ;;  %v486_v35 = vrot.slane %v485_v44, 2 }
  0x26   : > { %v1135_v50 = vpop.eup %1134  ;;  %v998_v63 = vadd.f32 %v997_v58, %v996_v46  ;;  %v1373_v9 = vmul.f32 0.6931472, %v1133_v52  ;;  %1160 = vlog2.f32 %v218_v26  ;;  %v464_v18 = vrot.slane %v463_v54, 1 }
  0x27   : > { %v1137_v8 = vpop.eup %1136  ;;  %v1376_v17 = vmul.f32 0.6931472, %v1135_v50  ;;  %1162 = vlog2.f32 %v219_v47  ;;  %v472_v19 = vrot.slane %v471_v62, 1  ;;  %v480_v25 = vrot.slane %v479_v57, 1 }
  0x28   : > { %v1139_v12 = vpop.eup %1138  ;;  %v1000_v20 = vadd.f32 %v1332_v60, %v998_v63  ;;  %v1382_v58 = vmul.f32 0.6931472, %v1137_v8  ;;  %1164 = vlog2.f32 %v220_v53  ;;  %v1389_v31 = vadd.f32 %v464_v18, %v463_v54 }
  0x29   : > { %v1141_v26 = vpop.eup %1140  ;;  %v1387_v30 = vmul.f32 0.6931472, %v1139_v12  ;;  %1166 = vlog2.f32 %v221_v4  ;;  %v1391_v33 = vadd.f32 %v472_v19, %v471_v62  ;;  %v1395_v60 = vadd.f32 %v480_v25, %v479_v57 }
  0x2a   : > { %v1143_v32 = vpop.eup %1142  ;;  %1001 = vadd.xlane.f32.xlu0 %v1000_v20  ;;  %v1393_v34 = vmul.f32 0.6931472, %v1141_v26  ;;  %1168 = vlog2.f32 %v222_v10  ;;  %v493_v38 = vadd.f32 %v492_v49, %v491_v40  ;;  %v498_v39 = vsel %vm271_vm3, %v219_v47, 0.0 }
  0x2b   : > { %v1145_v36 = vpop.eup %1144  ;;  %v1397_v37 = vmul.f32 0.6931472, %v1143_v32  ;;  %1170 = vlog2.f32 %v1380_v24  ;;  %v487_v45 = vadd.f32 %v486_v35, %v485_v44  ;;  %v499_v46 = vadd.f32 %v498_v39, %v1324_v55 }
  0x2c   : > { %v1147_v41 = vpop.eup %1146  ;;  %v1401_v42 = vmul.f32 0.6931472, %v1145_v36  ;;  %1172 = vlog2.f32 %v1385_v29  ;;  %v494_v54 = vrot.slane %v493_v38, 2  ;;  %v506_v62 = vsel %vm271_vm3, %v220_v53, 0.0 }
  0x2d   : > { %v1149_v48 = vpop.eup %1148  ;;  %v1405_v52 = vmul.f32 0.6931472, %v1147_v41  ;;  %v514_v50 = vsel %vm271_vm3, %v221_v4, 0.0  ;;  %v488_v47 = vrot.slane %v487_v45, 1  ;;  %v500_v49 = vrot.slane %v499_v46, 4 }
  0x2e   : > { %v1151_v63 = vpop.eup %1150  ;;  %v1409_v40 = vmul.f32 0.6931472, %v1149_v48  ;;  %v507_v57 = vadd.f32 %v506_v62, %v1329_v59  ;;  %v495_v44 = vadd.f32 %v494_v54, %v493_v38  ;;  %v1413_v55 = vadd.f32 %v514_v50, %v1335_v61 }
  0x2f   : > { %v1153_v8 = vpop.eup %1152  ;;  %v248_v18 = vmul.f32 0.6931472, %v1151_v63  ;;  %v1416_v19 = vsel %vm271_vm3, %v222_v10, 0.0  ;;  %v1418_v20 = vadd.f32 %v488_v47, %v487_v45  ;;  %v501_v4 = vadd.f32 %v500_v49, %v499_v46 }
  0x30   : > { %v1155_v12 = vpop.eup %1154  ;;  %v250_v53 = vmul.f32 0.6931472, %v1153_v8  ;;  %v508_v25 = vrot.slane %v507_v57, 4  ;;  %v496_v59 = vrot.slane %v495_v44, 1  ;;  %vm798_vm7 = vcmp.gt.f32.partialorder %v1264_v14, 0.0 }
  0x31   : > { %v1157_v26 = vpop.eup %1156  ;;  %v252_v32 = vmul.f32 0.6931472, %v1155_v12  ;;  %v1421_v35 = vsel %vm352_vm4, %v248_v18, 0.0  ;;  %v502_v10 = vrot.slane %v501_v4, 2  ;;  %vm799_vm8 = vcmp.gt.f32.partialorder %v1266_v15, 0.0 }
  0x32   : > { %v1159_v38 = vpop.eup %1158  ;;  %v254_v61 = vmul.f32 0.6931472, %v1157_v26  ;;  %v272_v39 = vsel %vm271_vm3, %v250_v53, 0.0  ;;  %v1425_v41 = vadd.f32 %v508_v25, %v507_v57  ;;  %v1429_v62 = vadd.f32 %v496_v59, %v495_v44 }
  0x33   : > { %v1161_v48 = vpop.eup %1160  ;;  %v256_v45 = vmul.f32 0.6931472, %v1159_v38  ;;  %v273_v46 = vadd.f32 %v272_v39, %v1370_v56  ;;  %v280_v54 = vsel %vm271_vm3, %v252_v32, 0.0  ;;  %v1433_v8 = vadd.f32 %v502_v10, %v501_v4 }
  0x34   : > { %v1163_v50 = vpop.eup %1162  ;;  %v258_v63 = vmul.f32 0.6931472, %v1161_v48  ;;  %v281_v47 = vadd.f32 %v280_v54, %v1373_v9  ;;  %v288_v49 = vsel %vm271_vm3, %v254_v61, 0.0  ;;  %vm800_vm9 = vcmp.gt.f32.partialorder %v1273_v16, 0.0 }
  0x35   : > { %v1165_v18 = vpop.eup %1164  ;;  %v260_v12 = vmul.f32 0.6931472, %v1163_v50  ;;  %v274_v57 = vrot.slane %v273_v46, 4  ;;  %v289_v53 = vadd.f32 %v288_v49, %v1376_v17  ;;  %v296_v25 = vsel %vm271_vm3, %v256_v45, 0.0 }
  0x36   : > { %v1167_v56 = vpop.eup %1166  ;;  %v262_v26 = vmul.f32 0.6931472, %v1165_v18  ;;  %v282_v32 = vrot.slane %v281_v47, 4  ;;  %v297_v44 = vadd.f32 %v296_v25, %v1382_v58  ;;  %v304_v59 = vsel %vm271_vm3, %v258_v63, 0.0 }
  0x37   : > { %v1169_v38 = vpop.eup %1168  ;;  %v264_v9 = vmul.f32 0.6931472, %v1167_v56  ;;  %v275_v39 = vadd.f32 %v274_v57, %v273_v46  ;;  %v290_v61 = vrot.slane %v289_v53, 4  ;;  %v305_v4 = vadd.f32 %v304_v59, %v1387_v30 }
  0x38   : > { %v1171_v10 = vpop.eup %1170  ;;  %v266_v48 = vmul.f32 0.6931472, %v1169_v38  ;;  %v283_v54 = vadd.f32 %v282_v32, %v281_v47  ;;  %v298_v50 = vrot.slane %v297_v44, 4  ;;  %v312_v17 = vsel %vm271_vm3, %v260_v12, 0.0 }
  0x39   : > { %v1173_v45 = vpop.eup %1172  ;;  %v268_v49 = vmul.f32 0.6931472, %v1171_v10  ;;  %v276_v18 = vrot.slane %v275_v39, 2  ;;  %v291_v51 = vadd.f32 %v290_v61, %v289_v53  ;;  %v306_v58 = vrot.slane %v305_v4, 4 }
  0x3a   : > { %v270_v25 = vmul.f32 0.6931472, %v1173_v45  ;;  %v284_v63 = vrot.slane %v283_v54, 2  ;;  %v299_v36 = vadd.f32 %v298_v50, %v297_v44  ;;  %v313_v46 = vadd.f32 %v312_v17, %v1393_v34 }
  0x3b   : > { %v277_v57 = vadd.f32 %v276_v18, %v275_v39  ;;  %v292_v56 = vrot.slane %v291_v51, 2  ;;  %v307_v30 = vadd.f32 %v306_v58, %v305_v4  ;;  %v320_v59 = vsel %vm271_vm3, %v262_v26, 0.0 }
  0x3c   : > { %v285_v47 = vadd.f32 %v284_v63, %v283_v54  ;;  %v300_v32 = vrot.slane %v299_v36, 2  ;;  %v314_v38 = vrot.slane %v313_v46, 4  ;;  %v321_v12 = vadd.f32 %v320_v59, %v1397_v37 }
  0x3d   : > { %v278_v7 = vrot.slane %v277_v57, 1  ;;  %v293_v10 = vadd.f32 %v292_v56, %v291_v51  ;;  %v308_v6 = vrot.slane %v307_v30, 2  ;;  %v328_v53 = vsel %vm271_vm3, %v264_v9, 0.0 }
  0x3e   : > { %v286_v61 = vrot.slane %v285_v47, 1  ;;  %v301_v45 = vadd.f32 %v300_v32, %v299_v36  ;;  %v315_v44 = vadd.f32 %v314_v38, %v313_v46  ;;  %v322_v50 = vrot.slane %v321_v12, 4 }
  0x3f   : > { %v279_v34 = vadd.f32 %v278_v7, %v277_v57  ;;  %v294_v39 = vrot.slane %v293_v10, 1  ;;  %v309_v17 = vadd.f32 %v308_v6, %v307_v30  ;;  %v329_v4 = vadd.f32 %v328_v53, %v1401_v42 }
  0x40   : > { %v287_v26 = vadd.f32 %v286_v61, %v285_v47  ;;  %v302_v54 = vrot.slane %v301_v45, 1  ;;  %v316_v18 = vrot.slane %v315_v44, 2  ;;  %v323_v58 = vadd.f32 %v322_v50, %v321_v12 }
  0x41   : > { %v295_v63 = vadd.f32 %v294_v39, %v293_v10  ;;  %v310_v37 = vrot.slane %v309_v17, 1  ;;  %v330_v59 = vrot.slane %v329_v4, 4  ;;  %v336_v51 = vsel %vm271_vm3, %v266_v48, 0.0 }
  0x42   : > { %v303_v56 = vadd.f32 %v302_v54, %v301_v45  ;;  %v317_v9 = vadd.f32 %v316_v18, %v315_v44  ;;  %v324_v28 = vrot.slane %v323_v58, 2  ;;  %v337_v36 = vadd.f32 %v336_v51, %v1405_v52 }
  0x43   : > { %v311_v46 = vadd.f32 %v310_v37, %v309_v17  ;;  %v331_v7 = vadd.f32 %v330_v59, %v329_v4  ;;  %v344_v6 = vsel %vm271_vm3, %v268_v49, 0.0  ;;  %v355_v42 = vsel %vm354_vm5, %v270_v25, 0.0 }
  0x44   : > { %v318_v57 = vrot.slane %v317_v9, 1  ;;  %v325_v30 = vadd.f32 %v324_v28, %v323_v58  ;;  %v338_v47 = vrot.slane %v337_v36, 4  ;;  %v345_v32 = vadd.f32 %v344_v6, %v1409_v40 }
  0x45   : > { %v332_v38 = vrot.slane %v331_v7, 2  ;;  %v356_v12 = vadd.f32 %v355_v42, %v1421_v35  ;;  %v374_v48 = vcombine.low %v279_v34, %v287_v26  ;;  %v375_v10 = vcombine.low %v295_v63, %v303_v56 }
  0x46   : > { %v319_v53 = vadd.f32 %v318_v57, %v317_v9  ;;  %v326_v61 = vrot.slane %v325_v30, 1  ;;  %v339_v45 = vadd.f32 %v338_v47, %v337_v36  ;;  %v346_v52 = vrot.slane %v345_v32, 4 }
  0x47   : > { %v333_v44 = vadd.f32 %v332_v38, %v331_v7  ;;  %v357_v50 = vrot.slane %v356_v12, 4  ;;  %v384_v49 = vrot.slane %v374_v48, %v1286_v23  ;;  %v391_v25 = vrot.slane %v375_v10, %v1286_v23 }
  0x48   : > { %v327_v39 = vadd.f32 %v326_v61, %v325_v30  ;;  %v340_v28 = vrot.slane %v339_v45, 2  ;;  %v347_v17 = vadd.f32 %v346_v52, %v345_v32  ;;  %v376_v4 = vcombine.low %v311_v46, %v319_v53 }
  0x49   : > { %v334_v40 = vrot.slane %v333_v44, 1  ;;  %v358_v54 = vadd.f32 %v357_v50, %v356_v12  ;;  %v406_v18 = vcombine.low %v384_v49, %v391_v25  ;;  %v504_v35 = vrot.slane %v1433_v8, 1 }
  0x4a   : > { %v341_v34 = vadd.f32 %v340_v28, %v339_v45  ;;  %v348_v26 = vrot.slane %v347_v17, 2  ;;  %v398_v58 = vrot.slane %v376_v4, %v1286_v23  ;;  %v510_v63 = vrot.slane %v1425_v41, 2 }
  0x4b   : > { %v335_v37 = vadd.f32 %v334_v40, %v333_v44  ;;  %v359_v59 = vrot.slane %v358_v54, 2  ;;  %v414_v51 = vrot.slane %v406_v18, %v1286_v23  ;;  %v505_v56 = vadd.f32 %v504_v35, %v1433_v8 }
  0x4c   : > { %v342_v9 = vrot.slane %v341_v34, 1  ;;  %v349_v36 = vadd.f32 %v348_v26, %v347_v17  ;;  %v511_v46 = vadd.f32 %v510_v63, %v1425_v41  ;;  %v1581_v7 = vrot.slane %v1413_v55, 4 }
  0x4d   : > { %v360_v42 = vadd.f32 %v359_v59, %v358_v54  ;;  %v377_v57 = vcombine.low %v327_v39, %v335_v37  ;;  %v523_v30 = vadd.f32 %v1416_v19, %v1346_v5  ;;  %v530_v47 = vsel %vm271_vm3, %v1380_v24, 0.0  ;;  %v226_v37 = vld [vmem:[#allocation2 + $0x8] sm:$0x7] }
  0x4e   : > { %v517_v6 = vadd.f32 %v1581_v7, %v1413_v55  ;;  %v343_v32 = vadd.f32 %v342_v9, %v341_v34  ;;  %v350_v38 = vrot.slane %v349_v36, 1  ;;  %v512_v12 = vrot.slane %v511_v46, 1 }
  0x4f   : > { %v361_v48 = vrot.slane %v360_v42, 1  ;;  %v405_v10 = vrot.slane %v377_v57, %v1286_v23  ;;  %v524_v41 = vrot.slane %v523_v30, 4  ;;  %v531_v53 = vadd.f32 %v530_v47, %v1353_v11 }
  0x50   : > { %v518_v8 = vrot.slane %v517_v6, 2  ;;  %v351_v61 = vadd.f32 %v350_v38, %v349_v36  ;;  %v513_v55 = vadd.f32 %v512_v12, %v511_v46  ;;  %v538_v52 = vsel %vm352_vm4, %v1359_v22, 0.0 }
  0x51   : > { %v362_v5 = vadd.f32 %v361_v48, %v360_v42  ;;  %v407_v19 = vcombine.low %v398_v58, %v405_v10  ;;  %v525_v44 = vadd.f32 %v524_v41, %v523_v30  ;;  %v532_v24 = vrot.slane %v531_v53, 4 }
  0x52   : > { %v519_v45 = vadd.f32 %v518_v8, %v517_v6  ;;  %v423_v50 = vcombine.low %v343_v32, %v351_v61  ;;  %v539_v25 = vsel %vm354_vm5, %v1385_v29, 0.0  ;;  %v558_v39 = vcombine.low %v1389_v31, %v1391_v33 }
  0x53   : > { %v421_v11 = vrot.slane %v407_v19, %v1286_v23  ;;  %v437_v28 = vrot.slane %v362_v5, %v1286_v23  ;;  %v526_v17 = vrot.slane %v525_v44, 2  ;;  %v533_v4 = vadd.f32 %v532_v24, %v531_v53 }
  0x54   : > { %v520_v49 = vrot.slane %v519_v45, 1  ;;  %v430_v22 = vrot.slane %v423_v50, %v1286_v23  ;;  %v540_v54 = vadd.f32 %v539_v25, %v538_v52  ;;  %v559_v18 = vcombine.low %v1395_v60, %v1418_v20 }
  0x55   : > { %v422_v35 = vcombine.low %v414_v51, %v421_v11  ;;  %v527_v34 = vadd.f32 %v526_v17, %v525_v44  ;;  %v534_v26 = vrot.slane %v533_v4, 2  ;;  %v560_v29 = vcombine.low %v1429_v62, %v505_v56 }
  0x56   : > { %v521_v40 = vadd.f32 %v520_v49, %v519_v45  ;;  %v438_v58 = vcombine.low %v430_v22, %v437_v28  ;;  %v541_v31 = vrot.slane %v540_v54, 4  ;;  %v568_v63 = vrot.slane %v558_v39, %v1286_v23 }
  0x57   : > { %v528_v59 = vrot.slane %v527_v34, 1  ;;  %v535_v9 = vadd.f32 %v534_v26, %v533_v4  ;;  %v575_v36 = vrot.slane %v559_v18, %v1286_v23  ;;  %v582_v60 = vrot.slane %v560_v29, %v1286_v23  ;;  %v457_v26 = vld [vmem:[#allocation3 + $0x8] sm:$0x7] }
  0x58   : > { %v561_v33 = vcombine.low %v513_v55, %v521_v40  ;;  %v445_v46 = vrot.slane %v438_v58, %v1286_v23  ;;  %v542_v7 = vadd.f32 %v541_v31, %v540_v54  ;;  %v1582_v56 = vunpack.c.0.s8 %v1288_v27 }
  0x59   : > { %v529_v51 = vadd.f32 %v528_v59, %v527_v34  ;;  %v536_v6 = vrot.slane %v535_v9, 1  ;;  %v590_v62 = vcombine.low %v568_v63, %v575_v36  ;;  %v655_v48 = vrot.slane %v422_v35, %v1311_v43 }
  0x5a   : > { %v589_v20 = vrot.slane %v561_v33, %v1286_v23  ;;  %v675_v42 = vsub.s32 %v1582_v56, %v1241_v1  ;;  %v449_v57 = vadd.f32 %v445_v46, %v226_v37  ;;  %v543_v30 = vrot.slane %v542_v7, 2 }
  0x5b   : > { %v537_v32 = vadd.f32 %v536_v6, %v535_v9  ;;  %v598_v38 = vrot.slane %v590_v62, %v1286_v23  ;;  %v662_v10 = vrot.slane %v422_v35, %v1340_v0  ;;  %v669_v27 = vrot.slane %v422_v35, %v1343_v3 }
  0x5c   : > { %v591_v47 = vcombine.low %v582_v60, %v589_v20  ;;  %455 = vst.msk [vmem:[#allocation2 + $0x8] sm:$0x7] %vm1243_vm0, %v449_v57  ;;  %v544_v12 = vadd.f32 %v543_v30, %v542_v7  ;;  %v676_v1 = vrot.slane %v422_v35, %v675_v42  ;;  %v761_v53 = vmul.f32 12.0, %v1262_v13  ;;  %v1583_v57 = vld [vmem:[#allocation6_spill] sm:$0xff] }
  0x5d   : > { %v607_v41 = vcombine.low %v529_v51, %v537_v32  ;;  %v762_v45 = vmul.f32 12.0, %v1264_v14  ;;  %v763_v52 = vmul.f32 12.0, %v1266_v15  ;;  %v764_v5 = vmul.f32 12.0, %v1273_v16 }
  0x5e   : > { %v605_v8 = vrot.slane %v591_v47, %v1286_v23  ;;  %v545_v61 = vrot.slane %v544_v12, 1  ;;  %v697_v24 = vmul.f32 %v655_v48, %v1262_v13  ;;  %v698_v50 = vmul.f32 %v662_v10, %v1264_v14 }
  0x5f   : > { %v614_v44 = vrot.slane %v607_v41, %v1286_v23  ;;  %v699_v49 = vmul.f32 %v669_v27, %v1266_v15  ;;  %v700_v25 = vmul.f32 %v676_v1, %v1273_v16  ;;  %v1090_v39 = vrot.slane %v761_v53, 10 }
  0x60   : > { %v606_v55 = vcombine.low %v598_v38, %v605_v8  ;;  %v546_v19 = vadd.f32 %v545_v61, %v544_v12  ;;  %v1091_v40 = vrot.slane %v762_v45, 10  ;;  %v1092_v54 = vrot.slane %v763_v52, 10  ;;  %v1584_v12 = vld [vmem:[#allocation4_spill] sm:$0xff] }
  0x61   : > { %v1093_v18 = vrot.slane %v764_v5, 10  ;;  %v766_v30 = vmul.f32 12.0, %v1583_v57  ;;  %vm801_vm10 = vcmp.gt.f32.partialorder %v1281_v21, 0.0  ;;  %vm802_vm11 = vcmp.gt.f32.partialorder %v1583_v57, 0.0 }
  0x62   : > { %v621_v11 = vrot.slane %v546_v19, %v1286_v23  ;;  %v713_v28 = vrot.slane %v606_v55, %v1311_v43  ;;  %v720_v17 = vrot.slane %v606_v55, %v1340_v0  ;;  %v727_v4 = vrot.slane %v606_v55, %v1343_v3 }
  0x63   : > { %v734_v22 = vrot.slane %v606_v55, %v675_v42  ;;  %v646_v46 = vld [vmem:[#allocation2 + $0x8] sm:$0x7]  ;;  %v765_v42 = vmul.f32 12.0, %v1281_v21  ;;  %v1095_v45 = vrot.slane %v766_v30, 10 }
  0x64   : > { %v622_v35 = vcombine.low %v614_v44, %v621_v11  ;;  %v755_v34 = vsub.f32 %v697_v24, %v713_v28  ;;  %v756_v29 = vsub.f32 %v698_v50, %v720_v17  ;;  %v757_v58 = vsub.f32 %v699_v49, %v727_v4 }
  0x65   : > { %v758_v31 = vsub.f32 %v700_v25, %v734_v22  ;;  %v683_v51 = vrot.slane %v646_v46, %v1311_v43  ;;  %v690_v56 = vrot.slane %v646_v46, %v1340_v0 }
  0x66   : > { %v629_v33 = vrot.slane %v622_v35, %v1286_v23  ;;  %v791_v63 = vsub.f32 %v755_v34, %v1090_v39  ;;  %v792_v37 = vsub.f32 %v756_v29, %v1091_v40  ;;  %v793_v59 = vsub.f32 %v757_v58, %v1092_v54 }
  0x67   : > { %v794_v9 = vsub.f32 %v758_v31, %v1093_v18  ;;  %v701_v10 = vmul.f32 %v683_v51, %v1281_v21  ;;  %v702_v27 = vmul.f32 %v690_v56, %v1583_v57 }
  0x68   : > { %v633_v36 = vadd.f32 %v629_v33, %v457_v26  ;;  %v809_v7 = vrot.slane %v791_v63, 7  ;;  %v810_v3 = vrot.slane %v792_v37, 7  ;;  %v811_v60 = vrot.slane %v793_v59, 7 }
  0x69   : > { %v812_v20 = vrot.slane %v794_v9, 7 }
  0x6a   : > { %635 = vst.msk [vmem:[#allocation3 + $0x8] sm:$0x7] %vm1243_vm0, %v633_v36  ;;  %v821_v23 = vmul.f32 %v809_v7, %v1262_v13  ;;  %v822_v6 = vmul.f32 %v810_v3, %v1264_v14  ;;  %v823_v62 = vmul.f32 %v811_v60, %v1266_v15  ;;  %v1585_v13 = vld [vmem:[#allocation5_spill] sm:$0xff] }
  0x6b   : > { %v824_v47 = vmul.f32 %v812_v20, %v1273_v16  ;;  %v1094_v16 = vrot.slane %v765_v42, 10 }
  0x6c   : > { %v827_v2 = vsel %vm797_vm6, %v821_v23, 0.0  ;;  %v828_v32 = vsel %vm798_vm7, %v822_v6, 0.0  ;;  %v829_v38 = vsel %vm799_vm8, %v823_v62, 0.0 }
  0x6d   : > { %v842_v8 = vrot.slane %v827_v2, %v1584_v12  ;;  %v846_v48 = vrot.slane %v827_v2, %v1585_v13  ;;  %v850_v14 = vrot.slane %v828_v32, %v1584_v12  ;;  %v854_v15 = vrot.slane %v828_v32, %v1585_v13 }
  0x6e   : > { %v858_v1 = vrot.slane %v829_v38, %v1584_v12  ;;  %v830_v52 = vsel %vm800_vm9, %v824_v47, 0.0  ;;  %v862_v24 = vrot.slane %v829_v38, %v1585_v13 }
  0x6f   : > { %v895_v41 = vsel %vm894_vm1, %v842_v8, 0.0  ;;  %v896_v53 = vsel %vm894_vm1, %v846_v48, 0.0  ;;  %v898_v61 = vsel %vm894_vm1, %v850_v14, 0.0  ;;  %v900_v50 = vsel %vm894_vm1, %v854_v15, 0.0 }
  0x70   : > { %v897_v5 = vadd.f32 %v896_v53, %v895_v41  ;;  %v866_v11 = vrot.slane %v830_v52, %v1584_v12  ;;  %v902_v28 = vsel %vm894_vm1, %v858_v1, 0.0  ;;  %v870_v40 = vrot.slane %v830_v52, %v1585_v13 }
  0x71   : > { %v704_v55 = vld [vmem:[#allocation3 + $0x8] sm:$0x7] }
  0x72   : > { %v741_v19 = vrot.slane %v704_v55, %v1311_v43  ;;  %v748_v44 = vrot.slane %v704_v55, %v1340_v0  ;;  %v899_v49 = vadd.f32 %v898_v61, %v897_v5  ;;  %v904_v43 = vsel %vm894_vm1, %v862_v24, 0.0 }
  0x73   : > { %v906_v35 = vsel %vm894_vm1, %v866_v11, 0.0  ;;  %v908_v58 = vsel %vm894_vm1, %v870_v40, 0.0 }
  0x74   : > { %v759_v25 = vsub.f32 %v701_v10, %v741_v19  ;;  %v760_v39 = vsub.f32 %v702_v27, %v748_v44  ;;  %v901_v17 = vadd.f32 %v900_v50, %v899_v49 }
  0x76   : > { %v795_v4 = vsub.f32 %v759_v25, %v1094_v16  ;;  %v796_v22 = vsub.f32 %v760_v39, %v1095_v45  ;;  %v903_v54 = vadd.f32 %v902_v28, %v901_v17 }
  0x78   : > { %v813_v0 = vrot.slane %v795_v4, 7  ;;  %v814_v18 = vrot.slane %v796_v22, 7  ;;  %v905_v34 = vadd.f32 %v904_v43, %v903_v54 }
  0x7a   : > { %v825_v26 = vmul.f32 %v813_v0, %v1281_v21  ;;  %v826_v29 = vmul.f32 %v814_v18, %v1583_v57  ;;  %v907_v31 = vadd.f32 %v906_v35, %v905_v34 }
  0x7c   : > { %v831_v33 = vsel %vm801_vm10, %v825_v26, 0.0  ;;  %v832_v63 = vsel %vm802_vm11, %v826_v29, 0.0  ;;  %v909_v36 = vadd.f32 %v908_v58, %v907_v31 }
  0x7d   : > { %v874_v37 = vrot.slane %v831_v33, %v1584_v12  ;;  %v878_v59 = vrot.slane %v831_v33, %v1585_v13  ;;  %v882_v9 = vrot.slane %v832_v63, %v1584_v12 }
  0x7f   : > { %v910_v46 = vsel %vm894_vm1, %v874_v37, 0.0  ;;  %v912_v7 = vsel %vm894_vm1, %v878_v59, 0.0  ;;  %v915_v3 = vsel %vm914_vm2, %v882_v9, 0.0 }
  0x80   : > { %v911_v21 = vadd.f32 %v910_v46, %v909_v36 }
  0x82   : > { %v913_v60 = vadd.f32 %v912_v7, %v911_v21 }
  0x84   : > { %v916_v20 = vadd.f32 %v915_v3, %v913_v60 }
  0x86   : > { %917 = vadd.xlane.f32.xlu0 %v916_v20 }
  0xb3   : > { %v1002_v23 = vpop.xlane.xlu0 %1001 }
  0xb4   : > { %v1003_v51 = vmul.f32 12.0, %v1002_v23 }
  0xb6   : > { %1174 = vrcp.f32 %v1003_v51 }
  0xc3   : > { %v1175_v6 = vpop.eup %1174 }
 0x10f   : > { %v918_v62 = vpop.xlane.xlu0 %917 }
 0x110   : > { %v1005_v56 = vmul.f32 %v1175_v6, %v918_v62 }
 0x112   : > { %1006 = vst [vmem:[%s190_s23 - $0x1] sm:$0x2] %v1005_v56 }
 0x113 PF: > { %s12_s11 = sadd.s32 1, %s1198_s11   ;;  %s1586_s9 = smov %s1194_s10 }
 0x114   : > { %p9_p5 = scmp.ge.s32.totalorder %s12_s11, 5   ;;  %s1587_s10 = smov %s1589_s12 }
 0x116   :  { %11 = sbr.rel (!%p9_p5) target bundleno = 2 (0x2), region = 69 }

</bundles_post_ra>
